<compile_context>
chip_gen: v6e
topology: v6e:2x2x1
jax: 0.10.0
libtpu: 0.0.40
codegen_flags: <defaults>
</compile_context>

<pallas_src>
import functools

import jax
import jax.numpy as jnp
from jax.experimental import pallas as pl
from jax.experimental.pallas import tpu as pltpu


def _round_up(x, m):
    return ((x + m - 1) // m) * m


def _cdiv(a, b):
    return (a + b - 1) // b


def mlp_kernel(x_ref, w_ref, b_ref, o_ref):
    # x_ref: (5, TB)  bf16  -- features on sublanes, batch on lanes
    # w_ref: (64, 16) bf16  -- 4 stacked zero-padded (16,16) weights, (out,in) layout
    # b_ref: (16, 4)  f32   -- column l = bias of layer l+1 (zero padded)
    # o_ref: (2, TB)  f32
    x = x_ref[...]                                   # (5, TB) bf16
    w = w_ref[...]                                   # (64, 16) bf16 (already cast at pack time)
    b = b_ref[...]                                   # (16, 4) f32

    w1 = w[0:16, 0:5]                                # (16, 5)
    w2 = w[16:32, :]                                 # (16, 16)
    w3 = w[32:48, :]                                 # (16, 16)
    w4 = w[48:50, :]                                 # (2, 16)
    b1 = b[:, 0:1]                                   # (16, 1)
    b2 = b[:, 1:2]
    b3 = b[:, 2:3]
    b4 = b[0:2, 3:4]                                 # (2, 1)

    h = jnp.dot(w1, x, preferred_element_type=jnp.float32) + b1     # (16, TB) f32
    h = jnp.maximum(h, 0.0).astype(jnp.bfloat16)
    h = jnp.dot(w2, h, preferred_element_type=jnp.float32) + b2
    h = jnp.maximum(h, 0.0).astype(jnp.bfloat16)
    h = jnp.dot(w3, h, preferred_element_type=jnp.float32) + b3
    h = jnp.maximum(h, 0.0).astype(jnp.bfloat16)
    y = jnp.dot(w4, h, preferred_element_type=jnp.float32) + b4     # (2, TB) f32
    o_ref[...] = jnp.tanh(y).astype(o_ref.dtype)


def pack_params(params):
    """Pack the 4 (out,in) weights (as bf16) / 4 biases (f32) into two slabs."""
    w_slab = jnp.zeros((64, 16), jnp.bfloat16)
    w_slab = w_slab.at[0:16, 0:5].set(params["w1"].astype(jnp.bfloat16))
    w_slab = w_slab.at[16:32, :].set(params["w2"].astype(jnp.bfloat16))
    w_slab = w_slab.at[32:48, :].set(params["w3"].astype(jnp.bfloat16))
    w_slab = w_slab.at[48:50, :].set(params["w4"].astype(jnp.bfloat16))
    b_slab = jnp.zeros((16, 4), jnp.float32)
    b_slab = b_slab.at[:, 0].set(params["b1"].astype(jnp.float32))
    b_slab = b_slab.at[:, 1].set(params["b2"].astype(jnp.float32))
    b_slab = b_slab.at[:, 2].set(params["b3"].astype(jnp.float32))
    b_slab = b_slab.at[0:2, 3].set(params["b4"].astype(jnp.float32))
    return w_slab, b_slab


def _choose_tiling(B, tile_b):
    """Pad batch only to a 128 multiple; pick a 128-multiple tile dividing it,
    keeping the grid >= 2 steps (v7x megacore) when there is enough work."""
    b128 = _round_up(max(B, 1), 128)
    n_steps = _cdiv(b128, tile_b)
    if b128 >= 256:
        n_steps = max(n_steps, 2)
    tb = _round_up(_cdiv(b128, n_steps), 128)
    grid_n = _cdiv(b128, tb)
    b_pad = grid_n * tb                      # at most ~grid_n*128 rows of waste
    return tb, grid_n, b_pad


def _mlp_transposed(xt, w_slab, b_slab, tile_b):
    """xt: (5, B) bf16 feature-major input. Returns (2, B) f32."""
    B = xt.shape[1]
    tb, grid_n, b_pad = _choose_tiling(B, tile_b)
    if b_pad > B:
        # Explicit zero pad: the grid stays even and never reads garbage tails.
        xt = jnp.pad(xt, ((0, 0), (0, b_pad - B)))

    # 2*(16*5 + 16*16 + 16*16 + 2*16) = 1248 FLOPs/row; ~18 B/row of HBM traffic.
    cost = pl.CostEstimate(
        flops=1248 * b_pad,
        transcendentals=2 * b_pad,
        bytes_accessed=(5 * 2 + 2 * 4) * b_pad + 64 * 16 * 2 + 16 * 4 * 4,
    )
    # Double-buffered x + out blocks; only raise the scoped-VMEM limit if a huge
    # tile would cross the 24-32 MiB default (matters on v7x's 64 MiB VMEM).
    step_bytes = 2 * (5 * tb * 2 + 2 * tb * 4)
    vmem_limit = int(step_bytes + (8 << 20)) if step_bytes > (24 << 20) else None

    out_t = pl.pallas_call(
        mlp_kernel,
        out_shape=jax.ShapeDtypeStruct((2, b_pad), jnp.float32),
        grid=(grid_n,),
        in_specs=[
            pl.BlockSpec((5, tb), lambda i: (0, i)),      # x^T, tiled over batch lanes
            pl.BlockSpec((64, 16), lambda i: (0, 0)),     # bf16 weight slab, VMEM-resident
            pl.BlockSpec((16, 4), lambda i: (0, 0)),      # f32 bias slab, VMEM-resident
        ],
        out_specs=pl.BlockSpec((2, tb), lambda i: (0, i)),
        compiler_params=pltpu.CompilerParams(
            dimension_semantics=("parallel",),            # megacore split on v7x
            vmem_limit_bytes=vmem_limit,
        ),
        cost_estimate=cost,
    )(xt, w_slab, b_slab)

    return out_t[:, :B]


@functools.partial(jax.jit, static_argnames=("tile_b",))
def net_forward(x, params, *, tile_b=65536):
    """x: (B, 5) float32; params: PyTorch-layout weights (out,in) and biases (out,).

    Returns (B, 2) float32.
    """
    w_slab, b_slab = pack_params(params)
    xt = x.astype(jnp.bfloat16).T            # cast first: transpose moves half the bytes
    out_t = _mlp_transposed(xt, w_slab, b_slab, tile_b)
    return out_t.T                            # (B, 2)


@functools.partial(jax.jit, static_argnames=("tile_b",))
def net_forward_feature_major(xt, params, *, tile_b=65536):
    """Layout-plumbing-free path: xt is (5, B); returns (2, B) float32."""
    w_slab, b_slab = pack_params(params)
    return _mlp_transposed(xt.astype(jnp.bfloat16), w_slab, b_slab, tile_b)


def init_params(key):
    """Deterministic init mimicking the PyTorch module's __init__.

    Weights kept in PyTorch (out_features, in_features) layout with the custom
    uniform(-a, a) init; biases keep nn.Linear's default
    uniform(-1/sqrt(fan_in), 1/sqrt(fan_in)).
    """
    d = 16
    layer_dims = [(5, d), (d, d), (d, d), (d, 2)]          # (fan_in, fan_out)
    a_vals = [
        (12.0 / (5 + d)) ** 0.5,
        (12.0 / (d + d)) ** 0.5,
        (12.0 / (d + d)) ** 0.5,
        (6.0 / (d + 2)) ** 0.5,
    ]
    params = {}
    keys = jax.random.split(key, 8)
    for i, ((fan_in, fan_out), a) in enumerate(zip(layer_dims, a_vals), start=1):
        wk, bk = keys[2 * (i - 1)], keys[2 * (i - 1) + 1]
        w = jax.random.uniform(wk, (fan_out, fan_in), jnp.float32, minval=-a, maxval=a)
        bound = 1.0 / (fan_in ** 0.5)
        b = jax.random.uniform(bk, (fan_out,), jnp.float32, minval=-bound, maxval=bound)
        params[f"w{i}"] = w
        params[f"b{i}"] = b
    return params


def reference_forward_f32(x, params):
    """Plain-JAX f32 reference (matches the PyTorch module's math exactly)."""
    h = jnp.maximum(x @ params["w1"].T + params["b1"], 0.0)
    h = jnp.maximum(h @ params["w2"].T + params["b2"], 0.0)
    h = jnp.maximum(h @ params["w3"].T + params["b3"], 0.0)
    return jnp.tanh(h @ params["w4"].T + params["b4"])


def reference_forward_bf16(x, params):
    """Plain-JAX reference matching the kernel's bf16-operand / f32-accum numerics."""
    h = x.astype(jnp.bfloat16).T
    for i in range(1, 4):
        w = params[f"w{i}"].astype(jnp.bfloat16)
        b = params[f"b{i}"][:, None]
        h = jnp.maximum(
            jnp.dot(w, h, preferred_element_type=jnp.float32) + b, 0.0
        ).astype(jnp.bfloat16)
    w4 = params["w4"].astype(jnp.bfloat16)
    y = jnp.dot(w4, h, preferred_element_type=jnp.float32) + params["b4"][:, None]
    return jnp.tanh(y).T


if __name__ == "__main__":
    key = jax.random.PRNGKey(0)
    pkey, xkey, xkey2 = jax.random.split(key, 3)
    params = init_params(pkey)

    # Small case (single grid step).
    batch = 8
    x = jax.random.normal(xkey, (batch, 5), dtype=jnp.float32)
    out = jax.block_until_ready(net_forward(x, params))
    assert out.shape == (batch, 2)
    ref_match = reference_forward_bf16(x, params)
    ref_f32 = reference_forward_f32(x, params)
    assert jnp.allclose(out, ref_match, atol=1e-4, rtol=1e-4), "mismatch vs bf16 reference"
    assert jnp.allclose(out, ref_f32, atol=5e-2, rtol=5e-2), "mismatch vs f32 reference"

    # Larger case exercising multi-step grid + 128-multiple batch padding.
    batch2 = 600
    x2 = jax.random.normal(xkey2, (batch2, 5), dtype=jnp.float32)
    out2 = jax.block_until_ready(net_forward(x2, params))
    assert out2.shape == (batch2, 2)
    assert jnp.allclose(out2, reference_forward_bf16(x2, params), atol=1e-4, rtol=1e-4)
    assert jnp.allclose(out2, reference_forward_f32(x2, params), atol=5e-2, rtol=5e-2)

    # Feature-major path (no wrapper transposes) must agree with the standard path.
    out2_fm = jax.block_until_ready(net_forward_feature_major(x2.T, params))
    assert out2_fm.shape == (2, batch2)
    assert jnp.allclose(out2_fm.T, out2, atol=1e-5, rtol=1e-5)

    print("KERNEL_OK")
</pallas_src>

<mosaic_0001>
module attributes {stable_mosaic.version = 11 : i64} {
  func.func @mlp_kernel(%arg0: i32, %arg1: memref<5x128xbf16, #tpu.memory_space<vmem>>, %arg2: memref<64x16xbf16, #tpu.memory_space<vmem>>, %arg3: memref<16x4xf32, #tpu.memory_space<vmem>>, %arg4: memref<2x128xf32, #tpu.memory_space<vmem>>) attributes {dimension_semantics = [#tpu.dimension_semantics<parallel>], iteration_bounds = array<i64: 1>, scalar_prefetch = 0 : i64, scratch_operands = 0 : i64, tpu.core_type = #tpu.core_type<tc>, window_params = [{transform_indices = @transform_0, window_bounds = array<i64: 5, 128>}, {pipeline_mode = #tpu.pipeline_mode<synchronous>, transform_indices = @transform_1, window_bounds = array<i64: 64, 16>}, {pipeline_mode = #tpu.pipeline_mode<synchronous>, transform_indices = @transform_2, window_bounds = array<i64: 16, 4>}, {transform_indices = @transform_3, window_bounds = array<i64: 2, 128>}]} {
    %c0 = arith.constant 0 : index
    %c0_0 = arith.constant 0 : index
    %0 = vector.load %arg1[%c0, %c0_0] : memref<5x128xbf16, #tpu.memory_space<vmem>>, vector<5x128xbf16>
    %c0_1 = arith.constant 0 : index
    %c0_2 = arith.constant 0 : index
    %1 = vector.load %arg2[%c0_1, %c0_2] : memref<64x16xbf16, #tpu.memory_space<vmem>>, vector<64x16xbf16>
    %c0_3 = arith.constant 0 : index
    %c0_4 = arith.constant 0 : index
    %2 = vector.load %arg3[%c0_3, %c0_4] : memref<16x4xf32, #tpu.memory_space<vmem>>, vector<16x4xf32>
    %3 = vector.extract_strided_slice %1 {offsets = [0, 0], sizes = [16, 5], strides = [1, 1]} : vector<64x16xbf16> to vector<16x5xbf16>
    %4 = vector.extract_strided_slice %1 {offsets = [16, 0], sizes = [16, 16], strides = [1, 1]} : vector<64x16xbf16> to vector<16x16xbf16>
    %5 = vector.extract_strided_slice %1 {offsets = [32, 0], sizes = [16, 16], strides = [1, 1]} : vector<64x16xbf16> to vector<16x16xbf16>
    %6 = vector.extract_strided_slice %1 {offsets = [48, 0], sizes = [2, 16], strides = [1, 1]} : vector<64x16xbf16> to vector<2x16xbf16>
    %7 = vector.extract_strided_slice %2 {offsets = [0, 0], sizes = [16, 1], strides = [1, 1]} : vector<16x4xf32> to vector<16x1xf32>
    %8 = vector.extract_strided_slice %2 {offsets = [0, 1], sizes = [16, 1], strides = [1, 1]} : vector<16x4xf32> to vector<16x1xf32>
    %9 = vector.extract_strided_slice %2 {offsets = [0, 2], sizes = [16, 1], strides = [1, 1]} : vector<16x4xf32> to vector<16x1xf32>
    %10 = vector.extract_strided_slice %2 {offsets = [0, 3], sizes = [2, 1], strides = [1, 1]} : vector<16x4xf32> to vector<2x1xf32>
    %cst = arith.constant dense<0.000000e+00> : vector<16x128xf32>
    %11 = tpu.matmul %3, %0, %cst {dimension_numbers = #tpu.dot_dimension_numbers<[1], [0], [0], [1], [0, 0, 1, 1], [], []>} : vector<16x5xbf16>, vector<5x128xbf16>, vector<16x128xf32> -> vector<16x128xf32>
    %12 = vector.broadcast %7 : vector<16x1xf32> to vector<16x128xf32>
    %13 = arith.addf %11, %12 : vector<16x128xf32>
    %cst_5 = arith.constant 0.000000e+00 : f32
    %14 = vector.broadcast %cst_5 : f32 to vector<16x128xf32>
    %15 = arith.maximumf %13, %14 : vector<16x128xf32>
    %16 = arith.truncf %15 : vector<16x128xf32> to vector<16x128xbf16>
    %cst_6 = arith.constant dense<0.000000e+00> : vector<16x128xf32>
    %17 = tpu.matmul %4, %16, %cst_6 {dimension_numbers = #tpu.dot_dimension_numbers<[1], [0], [0], [1], [0, 0, 1, 1], [], []>} : vector<16x16xbf16>, vector<16x128xbf16>, vector<16x128xf32> -> vector<16x128xf32>
    %18 = vector.broadcast %8 : vector<16x1xf32> to vector<16x128xf32>
    %19 = arith.addf %17, %18 : vector<16x128xf32>
    %cst_7 = arith.constant 0.000000e+00 : f32
    %20 = vector.broadcast %cst_7 : f32 to vector<16x128xf32>
    %21 = arith.maximumf %19, %20 : vector<16x128xf32>
    %22 = arith.truncf %21 : vector<16x128xf32> to vector<16x128xbf16>
    %cst_8 = arith.constant dense<0.000000e+00> : vector<16x128xf32>
    %23 = tpu.matmul %5, %22, %cst_8 {dimension_numbers = #tpu.dot_dimension_numbers<[1], [0], [0], [1], [0, 0, 1, 1], [], []>} : vector<16x16xbf16>, vector<16x128xbf16>, vector<16x128xf32> -> vector<16x128xf32>
    %24 = vector.broadcast %9 : vector<16x1xf32> to vector<16x128xf32>
    %25 = arith.addf %23, %24 : vector<16x128xf32>
    %cst_9 = arith.constant 0.000000e+00 : f32
    %26 = vector.broadcast %cst_9 : f32 to vector<16x128xf32>
    %27 = arith.maximumf %25, %26 : vector<16x128xf32>
    %28 = arith.truncf %27 : vector<16x128xf32> to vector<16x128xbf16>
    %cst_10 = arith.constant dense<0.000000e+00> : vector<2x128xf32>
    %29 = tpu.matmul %6, %28, %cst_10 {dimension_numbers = #tpu.dot_dimension_numbers<[1], [0], [0], [1], [0, 0, 1, 1], [], []>} : vector<2x16xbf16>, vector<16x128xbf16>, vector<2x128xf32> -> vector<2x128xf32>
    %30 = vector.broadcast %10 : vector<2x1xf32> to vector<2x128xf32>
    %31 = arith.addf %29, %30 : vector<2x128xf32>
    %32 = math.tanh %31 : vector<2x128xf32>
    %c0_11 = arith.constant 0 : index
    %c0_12 = arith.constant 0 : index
    %33 = vector.load %arg4[%c0_11, %c0_12] : memref<2x128xf32, #tpu.memory_space<vmem>>, vector<2x128xf32>
    tpu.vector_store %arg4[%c0_11, %c0_12], %32 {strides = array<i32>} : memref<2x128xf32, #tpu.memory_space<vmem>>, vector<2x128xf32>,
    return
  }
  func.func @transform_0(%arg0: i32) -> (i32, i32) {
    %c0_i32 = arith.constant 0 : i32
    %c0_i32_0 = arith.constant 0 : i32
    return %c0_i32, %arg0 : i32, i32
  }
  func.func @transform_1(%arg0: i32) -> (i32, i32) {
    %c0_i32 = arith.constant 0 : i32
    %c0_i32_0 = arith.constant 0 : i32
    %c0_i32_1 = arith.constant 0 : i32
    return %c0_i32, %c0_i32_0 : i32, i32
  }
  func.func @transform_2(%arg0: i32) -> (i32, i32) {
    %c0_i32 = arith.constant 0 : i32
    %c0_i32_0 = arith.constant 0 : i32
    %c0_i32_1 = arith.constant 0 : i32
    return %c0_i32, %c0_i32_0 : i32, i32
  }
  func.func @transform_3(%arg0: i32) -> (i32, i32) {
    %c0_i32 = arith.constant 0 : i32
    %c0_i32_0 = arith.constant 0 : i32
    return %c0_i32, %arg0 : i32, i32
  }
}

</mosaic_0001>

<bundles_post_ra>
// kernel: net_forward.1
= control target key start
LH: loop header
LB: loop body
LE: loop exit
PB: predicated region body
PF: predicated region fallthrough
CT: control target
= control target key end

     0   :  { %vm44_vm0 = vcmask 1041408   ;;  %vm45_vm1 = vcmask 1042432   ;;  %v326_v0 = vmov 0.0   ;;  %v327_v2 = vmov 65535   ;;  %s384_s0 = inlined_call_operand.vmem [shape: bf16[5,128], index: 0, kind: input, shape index: {}]   ;;  %s385_s1 = inlined_call_operand.vmem [shape: bf16[64,16], index: 1, kind: input, shape index: {}]   ;;  %s386_s2 = inlined_call_operand.vmem [shape: f32[16,4], index: 2, kind: input, shape index: {}]   ;;  %s387_s3 = inlined_call_operand.vmem [shape: f32[2,128], index: 3, kind: output, shape index: {}]  }
   0x1   :  { %284 = vmatprep.subr.bf16.mxu0 %v326_v0  ;;  %v15_v1 = vld [vmem:[%s384_s0] sm:$0x7]  ;;  %v46_v3 = vsel %vm44_vm0, 4294967295, %v327_v2  ;;  %290 = vmatprep.subr.bf16.mxu1 %v326_v0  ;;  %vm328_vm2 = vmmov 0   ;;  %v329_v7 = vmov 0   ;;  %vm40_vm3 = vcmask 39936  }
   0x2   :  { %v47_v4 = vsel %vm45_vm1, %v46_v3, 0  ;;  %286 = vmatprep.mubr.msk.bf16.mxu0 %vm328_vm2, %v326_v0  ;;  %292 = vmatprep.mubr.msk.bf16.mxu1 %vm328_vm2, %v326_v0  ;;  %v321_v6 = vld [vmem:[%s385_s1] sm:$0xff]   ;;  %v24_v9 = vld [vmem:[%s386_s2 + $0x8] sm:$0xff]  ;;  %v330_v10 = vmov 1   ;;  %vm108_vm4 = vcmask 130048   ;;  %v331_v23 = vmov 2  }
   0x3   :  { %v49_v5 = vand.u32 %v47_v4, %v15_v1  ;;  %315 = vset.pattern.permute.xlu0 %v329_v7  ;;  %v23_v8 = vld [vmem:[%s386_s2] sm:$0xff]  ;;  %316 = vset.pattern.permute.xlu1 %v330_v10  ;;  %v322_v22 = vld [vmem:[%s385_s1 + $0x8] sm:$0xff]   ;;  %v323_v35 = vld [vmem:[%s385_s1 + $0x10] sm:$0xff]   ;;  %v332_v36 = vmov 3  }
   0x4   :  { %27 = vperm.xlu0 %315, %v23_v8   ;;  %96 = vperm.xlu1 %316, %v23_v8   ;;  %v22_v48 = vld [vmem:[%s385_s1 + $0x18] sm:$0xf] }
   0x5   :  { %285 = vmatpush3.bf16.msra.mxu0 %v49_v5 }
   0x6   :  { %296 = vmatprep.subr.bf16.mxu0 %v326_v0 }
   0x8   :  { %287 = vmatmul.mubr.msk.bf16.vlgmr.msra.gmra.mxu0 %vm40_vm3, %v321_v6  ;;  %32 = vperm.xlu0 %315, %v24_v9  }
   0x9   :  { %298 = vmatprep.mubr.msk.bf16.mxu0 %vm328_vm2, %v326_v0  ;;  %100 = vperm.xlu1 %316, %v24_v9  }
   0xc   :  { %317 = vset.pattern.permute.xlu0 %v331_v23 }
   0xd   :  { %318 = vset.pattern.permute.xlu1 %v331_v23  ;;  %157 = vperm.xlu0 %317, %v23_v8  }
   0xe   :  { %161 = vperm.xlu1 %318, %v24_v9  }
  0x11   :  { %320 = vset.pattern.permute.xlu0 %v332_v36 }
  0x12   :  { %319 = vset.pattern.permute.xlu1 %v332_v36 }
  0x13   :  { %217 = vperm.xlu1 %319, %v23_v8  }
  0x7f   :  { %v28_v11 = vpop.permute.xlu0 %27  ;;  %v97_v24 = vpop.permute.xlu1 %96 }
  0x83   :  { %v33_v15 = vpop.permute.xlu0 %32 }
  0x84   :  { %v101_v28 = vpop.permute.xlu1 %100 }
  0x88   :  { %v158_v37 = vpop.permute.xlu0 %157 }
  0x89   :  { %v162_v40 = vpop.permute.xlu1 %161 }
  0x8e   :  { %v218_v49 = vpop.permute.xlu1 %217 }
  0xc8   :  { %v85_v12 = vpop.f32.mrf.mxu0 }
  0xc9   :  { %v86_v14 = vadd.f32 %v85_v12, %v28_v11 }
  0xca   :  { %v288_v13 = vpop.f32.mrf.mxu0 }
  0xcb   :  { %v92_v19 = vmax.f32 %v86_v14, 0.0 }
  0xcc   :  { %v88_v16 = vpop.f32.mrf.mxu0 }
  0xcd   :  { %v89_v17 = vadd.f32 %v88_v16, %v33_v15 }
  0xce   :  { %v289_v18 = vpop.f32.mrf.mxu0 }
  0xcf   :  { %v93_v20 = vmax.f32 %v89_v17, 0.0 }
  0xd1   :  { %v94_v21 = vpack.c.bf16 %v93_v20, %v92_v19 }
  0xd3   :  { %291 = vmatpush3.bf16.msra.mxu1 %v94_v21 }
  0xd4   :  { %302 = vmatprep.subr.bf16.mxu1 %v326_v0 }
  0xd6   :  { %293 = vmatmul.mubr.msk.bf16.vlgmr.msra.gmra.mxu1 %vm108_vm4, %v322_v22 }
  0xd7   :  { %304 = vmatprep.mubr.msk.bf16.mxu1 %vm328_vm2, %v326_v0 }
 0x196   :  { %v146_v25 = vpop.f32.mrf.mxu1 }
 0x197   :  { %v147_v27 = vadd.f32 %v146_v25, %v97_v24 }
 0x198   :  { %v294_v26 = vpop.f32.mrf.mxu1 }
 0x199   :  { %v153_v32 = vmax.f32 %v147_v27, 0.0 }
 0x19a   :  { %v149_v29 = vpop.f32.mrf.mxu1 }
 0x19b   :  { %v150_v30 = vadd.f32 %v149_v29, %v101_v28 }
 0x19c   :  { %v295_v31 = vpop.f32.mrf.mxu1 }
 0x19d   :  { %v154_v33 = vmax.f32 %v150_v30, 0.0 }
 0x19f   :  { %v155_v34 = vpack.c.bf16 %v154_v33, %v153_v32 }
 0x1a1   :  { %297 = vmatpush3.bf16.msra.mxu0 %v155_v34 }
 0x1a4   :  { %299 = vmatmul.mubr.msk.bf16.vlgmr.msra.gmra.mxu0 %vm108_vm4, %v323_v35 }
 0x264   :  { %v206_v38 = vpop.f32.mrf.mxu0 }
 0x265   :  { %v207_v41 = vadd.f32 %v206_v38, %v158_v37 }
 0x266   :  { %v300_v39 = vpop.f32.mrf.mxu0 }
 0x267   :  { %v213_v45 = vmax.f32 %v207_v41, 0.0 }
 0x268   :  { %v209_v42 = vpop.f32.mrf.mxu0 }
 0x269   :  { %v210_v43 = vadd.f32 %v209_v42, %v162_v40 }
 0x26a   :  { %v301_v44 = vpop.f32.mrf.mxu0 }
 0x26b   :  { %v214_v46 = vmax.f32 %v210_v43, 0.0 }
 0x26d   :  { %v215_v47 = vpack.c.bf16 %v214_v46, %v213_v45 }
 0x26f   :  { %303 = vmatpush3.bf16.msra.mxu1 %v215_v47 }
 0x272   :  { %305 = vmatmul.mubr.msk.bf16.vlgmr.msra.gmra.mxu1 %vm108_vm4, %v22_v48 }
 0x332   :  { %v257_v50 = vpop.f32.mrf.mxu1 }
 0x333   :  { %v258_v51 = vadd.f32 %v257_v50, %v218_v49 }
 0x334   :  { %v306_v52 = vpop.f32.mrf.mxu1 }
 0x335   :  { %324 = vtanh.f32 %v258_v51 }
 0x336   :  { %v260_v53 = vpop.f32.mrf.mxu1 }
 0x338   :  { %v307_v54 = vpop.f32.mrf.mxu1 }
 0x342   :  { %v325_v55 = vpop.eup %324 }
 0x343   :  { %264 = vst [vmem:[%s387_s3] sm:$0x3] %v325_v55 }

</bundles_post_ra>
